<compile_context>
chip_gen: v7x
topology: tpu7x:2x2x1
jax: 0.10.0
libtpu: 0.0.40
codegen_flags: <defaults>
</compile_context>

<pallas_src>
import functools

import jax
import jax.numpy as jnp
from jax.experimental import pallas as pl
from jax.experimental.pallas import tpu as pltpu

EPS = 1e-5
NEG_SLOPE = 0.01  # PyTorch nn.LeakyReLU default negative_slope


def _leaky(x):
    return jnp.where(x >= 0, x, NEG_SLOPE * x)


def _instance_norm(x, gamma, beta):
    """One-pass affine InstanceNorm over the last (lane-contiguous) axis. x: (C, HW)."""
    inv_n = 1.0 / x.shape[-1]
    mean = jnp.sum(x, axis=-1, keepdims=True) * inv_n
    mean_sq = jnp.sum(x * x, axis=-1, keepdims=True) * inv_n
    var = jnp.maximum(mean_sq - mean * mean, 0.0)  # guard one-pass cancellation
    return (x - mean) * (jax.lax.rsqrt(var + EPS) * gamma) + beta


def fusion_block_kernel(o_ref, s_ref, g1_ref, b1_ref, w_ref, g2_ref, b2_ref,
                        sb_ref, out_ref, acc_ref, *, W, matmul_dtype):
    o = o_ref[0]                      # (C, HW): spatial dims flattened onto lanes
    s = s_ref[0]
    HW = o.shape[-1]

    # ---- InstanceNorm2d on o, with 2*sigmoid(mix_w) pre-folded into gamma/beta ----
    o_bn = _instance_norm(o, g1_ref[...], b1_ref[...])

    # ---- mix + x2 scale: the s-branch coefficient 2*(1-m) arrives as an SMEM scalar ----
    x = _leaky(o_bn + s * sb_ref[0])  # ConvBlock.relu

    # ---- ReflectionPad2d(1) + 3x3 conv as 9 accumulating MXU matmuls ----
    # Boundary masks on the flattened row-major spatial index (cheap: width-HW iota).
    idx = jax.lax.broadcasted_iota(jnp.int32, (1, HW), 1)
    row_first = idx < W
    row_last = idx >= (HW - W)
    if (W & (W - 1)) == 0:
        col = idx & (W - 1)
    else:
        col = jax.lax.rem(idx, jnp.int32(W))
    col_first = col == 0
    col_last = col == (W - 1)

    # pltpu.roll matches jnp.roll: roll(v, k)[p] == v[p - k] (negative shifts written
    # as HW - k so all shift amounts are positive).
    x_m1 = pltpu.roll(x, W, 1)        # [p] -> x[p - W]  (row above)
    x_p1 = pltpu.roll(x, HW - W, 1)   # [p] -> x[p + W]  (row below)
    r_rows = (
        jnp.where(row_first, x_p1, x_m1),   # ky = 0 : row y-1 (reflected at y=0)
        x,                                  # ky = 1
        jnp.where(row_last, x_m1, x_p1),    # ky = 2 : row y+1 (reflected at y=H-1)
    )

    # Each tap is consumed by its matmul immediately, so only one tap is live at a time.
    # w_ref is (9, C, C) with tap index t = ky*3 + kx; acc_ref is VMEM (C, HW) f32.
    first = True
    for ky, v in enumerate(r_rows):
        v_m1 = pltpu.roll(v, 1, 1)        # [p] -> v[p - 1]  (left neighbor)
        v_p1 = pltpu.roll(v, HW - 1, 1)   # [p] -> v[p + 1]  (right neighbor)
        row_taps = (
            jnp.where(col_first, v_p1, v_m1),   # kx = 0 (reflected at x=0)
            v,                                  # kx = 1
            jnp.where(col_last, v_m1, v_p1),    # kx = 2 (reflected at x=W-1)
        )
        for kx, tap in enumerate(row_taps):
            t = ky * 3 + kx
            contrib = jnp.dot(w_ref[t], tap.astype(matmul_dtype),
                              preferred_element_type=jnp.float32)
            if first:
                acc_ref[...] = contrib          # init with the first tap (no zero-fill)
                first = False
            else:
                acc_ref[...] += contrib         # in-place accumulate (MRB on v7x)

    # ---- second InstanceNorm2d (ConvBlock.bn) + trailing LeakyReLU ----
    y = _instance_norm(acc_ref[...], g2_ref[...], b2_ref[...])
    out_ref[0] = _leaky(y)


def fusion_block(o, s, params, *, matmul_dtype=jnp.float32):
    B, C, H, W = o.shape
    HW = H * W

    o3 = o.reshape(B, C, HW).astype(jnp.float32)
    s3 = s.reshape(B, C, HW).astype(jnp.float32)

    # Fold 2*sigmoid(mix_w) into the first InstanceNorm's affine params (host side);
    # the kernel only needs the s-branch coefficient 2*(1-m).
    m = jax.nn.sigmoid(params["mix_w"].reshape(())).astype(jnp.float32)
    a = 2.0 * m
    bn1_w = (params["bn1_w"].astype(jnp.float32) * a).reshape(C, 1)
    bn1_b = (params["bn1_b"].astype(jnp.float32) * a).reshape(C, 1)
    bn2_w = params["bn2_w"].reshape(C, 1).astype(jnp.float32)
    bn2_b = params["bn2_b"].reshape(C, 1).astype(jnp.float32)
    s_coef = jnp.reshape(2.0 * (1.0 - m), (1,)).astype(jnp.float32)  # SMEM scalar

    # OIHW -> (KH, KW, O, I) -> (9, O, I): per-tap matmul weights, tap t = ky*3 + kx,
    # matching the tap ordering in the kernel loop.
    w_taps = params["conv_w"].transpose(2, 3, 0, 1).reshape(9, C, C).astype(matmul_dtype)

    # Explicit scoped-VMEM budget: double-buffered (1, C, HW) blocks for o/s/out, the
    # (C, HW) f32 accumulator scratch, the (9, C, C) weights, plus headroom for the
    # elementwise intermediates (x, rolled rows, one live tap).
    plane = C * HW * 4
    vmem_bytes = (
        2 * 2 * plane                                        # o, s (double-buffered)
        + 2 * plane                                          # out (double-buffered)
        + plane                                              # acc scratch
        + 2 * 9 * C * C * jnp.dtype(matmul_dtype).itemsize   # conv tap weights
        + 10 * plane                                         # intermediates headroom
        + (2 << 20)                                          # misc / compiler internal
    )
    # TODO(synk): for production C*HW that exceeds v7x's 64 MiB even with this layout,
    # add a spatial (H) tile axis with a 1-row halo and a separate stats/normalize pass.
    vmem_limit = int(min(max(vmem_bytes, 4 << 20), 100 << 20))

    kernel = functools.partial(fusion_block_kernel, W=W, matmul_dtype=matmul_dtype)

    out3 = pl.pallas_call(
        kernel,
        out_shape=jax.ShapeDtypeStruct((B, C, HW), jnp.float32),
        grid_spec=pltpu.PrefetchScalarGridSpec(
            num_scalar_prefetch=0,
            grid=(B,),
            in_specs=[
                pl.BlockSpec((1, C, HW), lambda bi: (bi, 0, 0)),    # o (lane-dense)
                pl.BlockSpec((1, C, HW), lambda bi: (bi, 0, 0)),    # s (lane-dense)
                pl.BlockSpec((C, 1), lambda bi: (0, 0)),            # bn1 gamma * 2m
                pl.BlockSpec((C, 1), lambda bi: (0, 0)),            # bn1 beta  * 2m
                pl.BlockSpec((9, C, C), lambda bi: (0, 0, 0)),      # per-tap conv weights
                pl.BlockSpec((C, 1), lambda bi: (0, 0)),            # bn2 gamma
                pl.BlockSpec((C, 1), lambda bi: (0, 0)),            # bn2 beta
                pl.BlockSpec(memory_space=pltpu.MemorySpace.SMEM),  # 2*(1-m)
            ],
            out_specs=pl.BlockSpec((1, C, HW), lambda bi: (bi, 0, 0)),
            scratch_shapes=[pltpu.VMEM((C, HW), jnp.float32)],      # conv accumulator
        ),
        # TODO(synk): when B == 1 on v7x (2 TCs), add a second "parallel" grid axis
        # (e.g. split conv output channels for the matmul/bn2/leaky epilogue) so both
        # TensorCores are used; for tiny problems fold the whole batch into one step.
        compiler_params=pltpu.CompilerParams(
            dimension_semantics=("parallel",),
            vmem_limit_bytes=vmem_limit,
        ),
    )(o3, s3, bn1_w, bn1_b, w_taps, bn2_w, bn2_b, s_coef)

    return out3.reshape(B, C, H, W)


def reference(o, s, p):
    """Pure-JAX reference matching the PyTorch forward (for verification)."""
    def inorm(x, g, b):
        mean = x.mean(axis=(2, 3), keepdims=True)
        var = ((x - mean) ** 2).mean(axis=(2, 3), keepdims=True)
        return (x - mean) * jax.lax.rsqrt(var + EPS) * g[None, :, None, None] \
            + b[None, :, None, None]

    o_bn = inorm(o, p["bn1_w"], p["bn1_b"])
    m = jax.nn.sigmoid(p["mix_w"])[0]
    x = 2.0 * (o_bn * m + s * (1.0 - m))
    x = jnp.where(x >= 0, x, NEG_SLOPE * x)
    xp = jnp.pad(x, ((0, 0), (0, 0), (1, 1), (1, 1)), mode="reflect")
    y = jax.lax.conv_general_dilated(
        xp, p["conv_w"], window_strides=(1, 1), padding="VALID",
        dimension_numbers=("NCHW", "OIHW", "NCHW"))
    y = inorm(y, p["bn2_w"], p["bn2_b"])
    return jnp.where(y >= 0, y, NEG_SLOPE * y)


if __name__ == "__main__":
    B, C, H, W = 2, 4, 16, 16
    key = jax.random.PRNGKey(0)
    k_o, k_s, k_w = jax.random.split(key, 3)

    o = jax.random.normal(k_o, (B, C, H, W), dtype=jnp.float32)
    s = jax.random.normal(k_s, (B, C, H, W), dtype=jnp.float32)

    params = {
        # InstanceNorm2d(affine=True) default init: weight=1, bias=0
        "bn1_w": jnp.ones((C,), jnp.float32),
        "bn1_b": jnp.zeros((C,), jnp.float32),
        # Conv2d(C, C, 3, bias=False) weight, deterministic random init
        "conv_w": 0.1 * jax.random.normal(k_w, (C, C, 3, 3), dtype=jnp.float32),
        "bn2_w": jnp.ones((C,), jnp.float32),
        "bn2_b": jnp.zeros((C,), jnp.float32),
        # Mix parameter m = -0.8
        "mix_w": jnp.array([-0.8], jnp.float32),
    }

    out = fusion_block(o, s, params)
    out = jax.block_until_ready(out)

    ref = reference(o, s, params)
    assert out.shape == (B, C, H, W)
    assert jnp.allclose(out, ref, atol=2e-4, rtol=2e-4), \
        float(jnp.max(jnp.abs(out - ref)))

    print("KERNEL_OK")
</pallas_src>

<mosaic_0001>
module attributes {stable_mosaic.version = 11 : i64} {
  func.func @fusion_block_kernel(%arg0: i32, %arg1: memref<1x4x256xf32, #tpu.memory_space<vmem>>, %arg2: memref<1x4x256xf32, #tpu.memory_space<vmem>>, %arg3: memref<4x1xf32, #tpu.memory_space<vmem>>, %arg4: memref<4x1xf32, #tpu.memory_space<vmem>>, %arg5: memref<9x4x4xf32, #tpu.memory_space<vmem>>, %arg6: memref<4x1xf32, #tpu.memory_space<vmem>>, %arg7: memref<4x1xf32, #tpu.memory_space<vmem>>, %arg8: memref<1xf32, #tpu.memory_space<smem>>, %arg9: memref<1x4x256xf32, #tpu.memory_space<vmem>>, %arg10: memref<4x256xf32, #tpu.memory_space<vmem>>) attributes {dimension_semantics = [#tpu.dimension_semantics<parallel>], iteration_bounds = array<i64: 2>, scalar_prefetch = 0 : i64, scratch_operands = 1 : i64, tpu.core_type = #tpu.core_type<tc>, window_params = [{transform_indices = @transform_0, window_bounds = array<i64: 1, 4, 256>}, {transform_indices = @transform_1, window_bounds = array<i64: 1, 4, 256>}, {pipeline_mode = #tpu.pipeline_mode<synchronous>, transform_indices = @transform_2, window_bounds = array<i64: 4, 1>}, {pipeline_mode = #tpu.pipeline_mode<synchronous>, transform_indices = @transform_3, window_bounds = array<i64: 4, 1>}, {pipeline_mode = #tpu.pipeline_mode<synchronous>, transform_indices = @transform_4, window_bounds = array<i64: 9, 4, 4>}, {pipeline_mode = #tpu.pipeline_mode<synchronous>, transform_indices = @transform_5, window_bounds = array<i64: 4, 1>}, {pipeline_mode = #tpu.pipeline_mode<synchronous>, transform_indices = @transform_6, window_bounds = array<i64: 4, 1>}, {transform_indices = @transform_7, window_bounds = array<i64: 1>}, {transform_indices = @transform_8, window_bounds = array<i64: 1, 4, 256>}]} {
    %c0 = arith.constant 0 : index
    %c0_0 = arith.constant 0 : index
    %c0_1 = arith.constant 0 : index
    %0 = vector.load %arg1[%c0, %c0_0, %c0_1] : memref<1x4x256xf32, #tpu.memory_space<vmem>>, vector<1x4x256xf32>
    %1 = vector.shape_cast %0 : vector<1x4x256xf32> to vector<4x256xf32>
    %c0_2 = arith.constant 0 : index
    %c0_3 = arith.constant 0 : index
    %c0_4 = arith.constant 0 : index
    %2 = vector.load %arg2[%c0_2, %c0_3, %c0_4] : memref<1x4x256xf32, #tpu.memory_space<vmem>>, vector<1x4x256xf32>
    %3 = vector.shape_cast %2 : vector<1x4x256xf32> to vector<4x256xf32>
    %c0_5 = arith.constant 0 : index
    %c0_6 = arith.constant 0 : index
    %4 = vector.load %arg3[%c0_5, %c0_6] : memref<4x1xf32, #tpu.memory_space<vmem>>, vector<4x1xf32>
    %c0_7 = arith.constant 0 : index
    %c0_8 = arith.constant 0 : index
    %5 = vector.load %arg4[%c0_7, %c0_8] : memref<4x1xf32, #tpu.memory_space<vmem>>, vector<4x1xf32>
    %cst = arith.constant dense<0.000000e+00> : vector<4xf32>
    %6 = vector.multi_reduction <add>, %1, %cst [1] : vector<4x256xf32> to vector<4xf32>
    %7 = vector.shape_cast %6 : vector<4xf32> to vector<4x1xf32>
    %cst_9 = arith.constant 3.906250e-03 : f32
    %8 = vector.broadcast %cst_9 : f32 to vector<4x1xf32>
    %9 = arith.mulf %7, %8 : vector<4x1xf32>
    %10 = arith.mulf %1, %1 : vector<4x256xf32>
    %cst_10 = arith.constant dense<0.000000e+00> : vector<4xf32>
    %11 = vector.multi_reduction <add>, %10, %cst_10 [1] : vector<4x256xf32> to vector<4xf32>
    %12 = vector.shape_cast %11 : vector<4xf32> to vector<4x1xf32>
    %cst_11 = arith.constant 3.906250e-03 : f32
    %13 = vector.broadcast %cst_11 : f32 to vector<4x1xf32>
    %14 = arith.mulf %12, %13 : vector<4x1xf32>
    %15 = arith.mulf %9, %9 : vector<4x1xf32>
    %16 = arith.subf %14, %15 : vector<4x1xf32>
    %cst_12 = arith.constant 0.000000e+00 : f32
    %17 = vector.broadcast %cst_12 : f32 to vector<4x1xf32>
    %18 = arith.maximumf %16, %17 : vector<4x1xf32>
    %19 = vector.broadcast %9 : vector<4x1xf32> to vector<4x256xf32>
    %20 = arith.subf %1, %19 : vector<4x256xf32>
    %cst_13 = arith.constant 9.99999974E-6 : f32
    %21 = vector.broadcast %cst_13 : f32 to vector<4x1xf32>
    %22 = arith.addf %18, %21 : vector<4x1xf32>
    %23 = math.rsqrt %22 : vector<4x1xf32>
    %24 = arith.mulf %23, %4 : vector<4x1xf32>
    %25 = vector.broadcast %24 : vector<4x1xf32> to vector<4x256xf32>
    %26 = arith.mulf %20, %25 : vector<4x256xf32>
    %27 = vector.broadcast %5 : vector<4x1xf32> to vector<4x256xf32>
    %28 = arith.addf %26, %27 : vector<4x256xf32>
    %c0_14 = arith.constant 0 : index
    %29 = memref.load %arg8[%c0_14] : memref<1xf32, #tpu.memory_space<smem>>
    %30 = vector.broadcast %29 : f32 to vector<4x256xf32>
    %31 = arith.mulf %3, %30 : vector<4x256xf32>
    %32 = arith.addf %28, %31 : vector<4x256xf32>
    %cst_15 = arith.constant 0.000000e+00 : f32
    %33 = vector.broadcast %cst_15 : f32 to vector<4x256xf32>
    %34 = arith.cmpf oge, %32, %33 : vector<4x256xf32>
    %cst_16 = arith.constant 0.00999999977 : f32
    %35 = vector.broadcast %cst_16 : f32 to vector<4x256xf32>
    %36 = arith.mulf %35, %32 : vector<4x256xf32>
    %37 = arith.select %34, %32, %36 : vector<4x256xi1>, vector<4x256xf32>
    %38 = tpu.iota {dimensions = array<i32: 1>} : vector<1x256xi32>
    %c16_i32 = arith.constant 16 : i32
    %39 = vector.broadcast %c16_i32 : i32 to vector<1x256xi32>
    %40 = arith.cmpi slt, %38, %39 : vector<1x256xi32>
    %c240_i32 = arith.constant 240 : i32
    %41 = vector.broadcast %c240_i32 : i32 to vector<1x256xi32>
    %42 = arith.cmpi sge, %38, %41 : vector<1x256xi32>
    %c15_i32 = arith.constant 15 : i32
    %43 = vector.broadcast %c15_i32 : i32 to vector<1x256xi32>
    %44 = arith.andi %38, %43 : vector<1x256xi32>
    %c0_i32 = arith.constant 0 : i32
    %45 = vector.broadcast %c0_i32 : i32 to vector<1x256xi32>
    %46 = arith.cmpi eq, %44, %45 : vector<1x256xi32>
    %c15_i32_17 = arith.constant 15 : i32
    %47 = vector.broadcast %c15_i32_17 : i32 to vector<1x256xi32>
    %48 = arith.cmpi eq, %44, %47 : vector<1x256xi32>
    %c16_i32_18 = arith.constant 16 : i32
    %49 = tpu.dynamic_rotate %37 by %c16_i32_18 dim 1 : vector<4x256xf32>, i32 -> vector<4x256xf32>
    %c240_i32_19 = arith.constant 240 : i32
    %50 = tpu.dynamic_rotate %37 by %c240_i32_19 dim 1 : vector<4x256xf32>, i32 -> vector<4x256xf32>
    %51 = vector.shape_cast %40 : vector<1x256xi1> to vector<1x256xi1>
    %52 = vector.broadcast %51 : vector<1x256xi1> to vector<4x256xi1>
    %53 = arith.select %52, %50, %49 : vector<4x256xi1>, vector<4x256xf32>
    %54 = vector.shape_cast %42 : vector<1x256xi1> to vector<1x256xi1>
    %55 = vector.broadcast %54 : vector<1x256xi1> to vector<4x256xi1>
    %56 = arith.select %55, %49, %50 : vector<4x256xi1>, vector<4x256xf32>
    %c1_i32 = arith.constant 1 : i32
    %57 = tpu.dynamic_rotate %53 by %c1_i32 dim 1 : vector<4x256xf32>, i32 -> vector<4x256xf32>
    %c255_i32 = arith.constant 255 : i32
    %58 = tpu.dynamic_rotate %53 by %c255_i32 dim 1 : vector<4x256xf32>, i32 -> vector<4x256xf32>
    %59 = vector.shape_cast %46 : vector<1x256xi1> to vector<1x256xi1>
    %60 = vector.broadcast %59 : vector<1x256xi1> to vector<4x256xi1>
    %61 = arith.select %60, %58, %57 : vector<4x256xi1>, vector<4x256xf32>
    %62 = vector.shape_cast %48 : vector<1x256xi1> to vector<1x256xi1>
    %63 = vector.broadcast %62 : vector<1x256xi1> to vector<4x256xi1>
    %64 = arith.select %63, %57, %58 : vector<4x256xi1>, vector<4x256xf32>
    %c0_20 = arith.constant 0 : index
    %c0_21 = arith.constant 0 : index
    %c0_22 = arith.constant 0 : index
    %65 = vector.load %arg5[%c0_20, %c0_21, %c0_22] : memref<9x4x4xf32, #tpu.memory_space<vmem>>, vector<1x4x4xf32>
    %66 = vector.shape_cast %65 : vector<1x4x4xf32> to vector<4x4xf32>
    %cst_23 = arith.constant dense<0.000000e+00> : vector<4x256xf32>
    %67 = tpu.matmul %66, %61, %cst_23 {dimension_numbers = #tpu.dot_dimension_numbers<[1], [0], [0], [1], [0, 0, 1, 1], [], []>} : vector<4x4xf32>, vector<4x256xf32>, vector<4x256xf32> -> vector<4x256xf32>
    %c0_24 = arith.constant 0 : index
    %c0_25 = arith.constant 0 : index
    %68 = vector.load %arg10[%c0_24, %c0_25] : memref<4x256xf32, #tpu.memory_space<vmem>>, vector<4x256xf32>
    tpu.vector_store %arg10[%c0_24, %c0_25], %67 {strides = array<i32>} : memref<4x256xf32, #tpu.memory_space<vmem>>, vector<4x256xf32>,
    %c1 = arith.constant 1 : index
    %c0_26 = arith.constant 0 : index
    %c0_27 = arith.constant 0 : index
    %69 = vector.load %arg5[%c1, %c0_26, %c0_27] : memref<9x4x4xf32, #tpu.memory_space<vmem>>, vector<1x4x4xf32>
    %70 = vector.shape_cast %69 : vector<1x4x4xf32> to vector<4x4xf32>
    %cst_28 = arith.constant dense<0.000000e+00> : vector<4x256xf32>
    %71 = tpu.matmul %70, %53, %cst_28 {dimension_numbers = #tpu.dot_dimension_numbers<[1], [0], [0], [1], [0, 0, 1, 1], [], []>} : vector<4x4xf32>, vector<4x256xf32>, vector<4x256xf32> -> vector<4x256xf32>
    %c0_29 = arith.constant 0 : index
    %c0_30 = arith.constant 0 : index
    %72 = vector.load %arg10[%c0_29, %c0_30] : memref<4x256xf32, #tpu.memory_space<vmem>>, vector<4x256xf32>
    %73 = arith.addf %72, %71 : vector<4x256xf32>
    %c0_31 = arith.constant 0 : index
    %c0_32 = arith.constant 0 : index
    %74 = vector.load %arg10[%c0_31, %c0_32] : memref<4x256xf32, #tpu.memory_space<vmem>>, vector<4x256xf32>
    tpu.vector_store %arg10[%c0_31, %c0_32], %73 {strides = array<i32>} : memref<4x256xf32, #tpu.memory_space<vmem>>, vector<4x256xf32>,
    %c2 = arith.constant 2 : index
    %c0_33 = arith.constant 0 : index
    %c0_34 = arith.constant 0 : index
    %75 = vector.load %arg5[%c2, %c0_33, %c0_34] : memref<9x4x4xf32, #tpu.memory_space<vmem>>, vector<1x4x4xf32>
    %76 = vector.shape_cast %75 : vector<1x4x4xf32> to vector<4x4xf32>
    %cst_35 = arith.constant dense<0.000000e+00> : vector<4x256xf32>
    %77 = tpu.matmul %76, %64, %cst_35 {dimension_numbers = #tpu.dot_dimension_numbers<[1], [0], [0], [1], [0, 0, 1, 1], [], []>} : vector<4x4xf32>, vector<4x256xf32>, vector<4x256xf32> -> vector<4x256xf32>
    %c0_36 = arith.constant 0 : index
    %c0_37 = arith.constant 0 : index
    %78 = vector.load %arg10[%c0_36, %c0_37] : memref<4x256xf32, #tpu.memory_space<vmem>>, vector<4x256xf32>
    %79 = arith.addf %78, %77 : vector<4x256xf32>
    %c0_38 = arith.constant 0 : index
    %c0_39 = arith.constant 0 : index
    %80 = vector.load %arg10[%c0_38, %c0_39] : memref<4x256xf32, #tpu.memory_space<vmem>>, vector<4x256xf32>
    tpu.vector_store %arg10[%c0_38, %c0_39], %79 {strides = array<i32>} : memref<4x256xf32, #tpu.memory_space<vmem>>, vector<4x256xf32>,
    %c1_i32_40 = arith.constant 1 : i32
    %81 = tpu.dynamic_rotate %37 by %c1_i32_40 dim 1 : vector<4x256xf32>, i32 -> vector<4x256xf32>
    %c255_i32_41 = arith.constant 255 : i32
    %82 = tpu.dynamic_rotate %37 by %c255_i32_41 dim 1 : vector<4x256xf32>, i32 -> vector<4x256xf32>
    %83 = vector.shape_cast %46 : vector<1x256xi1> to vector<1x256xi1>
    %84 = vector.broadcast %83 : vector<1x256xi1> to vector<4x256xi1>
    %85 = arith.select %84, %82, %81 : vector<4x256xi1>, vector<4x256xf32>
    %86 = vector.shape_cast %48 : vector<1x256xi1> to vector<1x256xi1>
    %87 = vector.broadcast %86 : vector<1x256xi1> to vector<4x256xi1>
    %88 = arith.select %87, %81, %82 : vector<4x256xi1>, vector<4x256xf32>
    %c3 = arith.constant 3 : index
    %c0_42 = arith.constant 0 : index
    %c0_43 = arith.constant 0 : index
    %89 = vector.load %arg5[%c3, %c0_42, %c0_43] : memref<9x4x4xf32, #tpu.memory_space<vmem>>, vector<1x4x4xf32>
    %90 = vector.shape_cast %89 : vector<1x4x4xf32> to vector<4x4xf32>
    %cst_44 = arith.constant dense<0.000000e+00> : vector<4x256xf32>
    %91 = tpu.matmul %90, %85, %cst_44 {dimension_numbers = #tpu.dot_dimension_numbers<[1], [0], [0], [1], [0, 0, 1, 1], [], []>} : vector<4x4xf32>, vector<4x256xf32>, vector<4x256xf32> -> vector<4x256xf32>
    %c0_45 = arith.constant 0 : index
    %c0_46 = arith.constant 0 : index
    %92 = vector.load %arg10[%c0_45, %c0_46] : memref<4x256xf32, #tpu.memory_space<vmem>>, vector<4x256xf32>
    %93 = arith.addf %92, %91 : vector<4x256xf32>
    %c0_47 = arith.constant 0 : index
    %c0_48 = arith.constant 0 : index
    %94 = vector.load %arg10[%c0_47, %c0_48] : memref<4x256xf32, #tpu.memory_space<vmem>>, vector<4x256xf32>
    tpu.vector_store %arg10[%c0_47, %c0_48], %93 {strides = array<i32>} : memref<4x256xf32, #tpu.memory_space<vmem>>, vector<4x256xf32>,
    %c4 = arith.constant 4 : index
    %c0_49 = arith.constant 0 : index
    %c0_50 = arith.constant 0 : index
    %95 = vector.load %arg5[%c4, %c0_49, %c0_50] : memref<9x4x4xf32, #tpu.memory_space<vmem>>, vector<1x4x4xf32>
    %96 = vector.shape_cast %95 : vector<1x4x4xf32> to vector<4x4xf32>
    %cst_51 = arith.constant dense<0.000000e+00> : vector<4x256xf32>
    %97 = tpu.matmul %96, %37, %cst_51 {dimension_numbers = #tpu.dot_dimension_numbers<[1], [0], [0], [1], [0, 0, 1, 1], [], []>} : vector<4x4xf32>, vector<4x256xf32>, vector<4x256xf32> -> vector<4x256xf32>
    %c0_52 = arith.constant 0 : index
    %c0_53 = arith.constant 0 : index
    %98 = vector.load %arg10[%c0_52, %c0_53] : memref<4x256xf32, #tpu.memory_space<vmem>>, vector<4x256xf32>
    %99 = arith.addf %98, %97 : vector<4x256xf32>
    %c0_54 = arith.constant 0 : index
    %c0_55 = arith.constant 0 : index
    %100 = vector.load %arg10[%c0_54, %c0_55] : memref<4x256xf32, #tpu.memory_space<vmem>>, vector<4x256xf32>
    tpu.vector_store %arg10[%c0_54, %c0_55], %99 {strides = array<i32>} : memref<4x256xf32, #tpu.memory_space<vmem>>, vector<4x256xf32>,
    %c5 = arith.constant 5 : index
    %c0_56 = arith.constant 0 : index
    %c0_57 = arith.constant 0 : index
    %101 = vector.load %arg5[%c5, %c0_56, %c0_57] : memref<9x4x4xf32, #tpu.memory_space<vmem>>, vector<1x4x4xf32>
    %102 = vector.shape_cast %101 : vector<1x4x4xf32> to vector<4x4xf32>
    %cst_58 = arith.constant dense<0.000000e+00> : vector<4x256xf32>
    %103 = tpu.matmul %102, %88, %cst_58 {dimension_numbers = #tpu.dot_dimension_numbers<[1], [0], [0], [1], [0, 0, 1, 1], [], []>} : vector<4x4xf32>, vector<4x256xf32>, vector<4x256xf32> -> vector<4x256xf32>
    %c0_59 = arith.constant 0 : index
    %c0_60 = arith.constant 0 : index
    %104 = vector.load %arg10[%c0_59, %c0_60] : memref<4x256xf32, #tpu.memory_space<vmem>>, vector<4x256xf32>
    %105 = arith.addf %104, %103 : vector<4x256xf32>
    %c0_61 = arith.constant 0 : index
    %c0_62 = arith.constant 0 : index
    %106 = vector.load %arg10[%c0_61, %c0_62] : memref<4x256xf32, #tpu.memory_space<vmem>>, vector<4x256xf32>
    tpu.vector_store %arg10[%c0_61, %c0_62], %105 {strides = array<i32>} : memref<4x256xf32, #tpu.memory_space<vmem>>, vector<4x256xf32>,
    %c1_i32_63 = arith.constant 1 : i32
    %107 = tpu.dynamic_rotate %56 by %c1_i32_63 dim 1 : vector<4x256xf32>, i32 -> vector<4x256xf32>
    %c255_i32_64 = arith.constant 255 : i32
    %108 = tpu.dynamic_rotate %56 by %c255_i32_64 dim 1 : vector<4x256xf32>, i32 -> vector<4x256xf32>
    %109 = vector.shape_cast %46 : vector<1x256xi1> to vector<1x256xi1>
    %110 = vector.broadcast %109 : vector<1x256xi1> to vector<4x256xi1>
    %111 = arith.select %110, %108, %107 : vector<4x256xi1>, vector<4x256xf32>
    %112 = vector.shape_cast %48 : vector<1x256xi1> to vector<1x256xi1>
    %113 = vector.broadcast %112 : vector<1x256xi1> to vector<4x256xi1>
    %114 = arith.select %113, %107, %108 : vector<4x256xi1>, vector<4x256xf32>
    %c6 = arith.constant 6 : index
    %c0_65 = arith.constant 0 : index
    %c0_66 = arith.constant 0 : index
    %115 = vector.load %arg5[%c6, %c0_65, %c0_66] : memref<9x4x4xf32, #tpu.memory_space<vmem>>, vector<1x4x4xf32>
    %116 = vector.shape_cast %115 : vector<1x4x4xf32> to vector<4x4xf32>
    %cst_67 = arith.constant dense<0.000000e+00> : vector<4x256xf32>
    %117 = tpu.matmul %116, %111, %cst_67 {dimension_numbers = #tpu.dot_dimension_numbers<[1], [0], [0], [1], [0, 0, 1, 1], [], []>} : vector<4x4xf32>, vector<4x256xf32>, vector<4x256xf32> -> vector<4x256xf32>
    %c0_68 = arith.constant 0 : index
    %c0_69 = arith.constant 0 : index
    %118 = vector.load %arg10[%c0_68, %c0_69] : memref<4x256xf32, #tpu.memory_space<vmem>>, vector<4x256xf32>
    %119 = arith.addf %118, %117 : vector<4x256xf32>
    %c0_70 = arith.constant 0 : index
    %c0_71 = arith.constant 0 : index
    %120 = vector.load %arg10[%c0_70, %c0_71] : memref<4x256xf32, #tpu.memory_space<vmem>>, vector<4x256xf32>
    tpu.vector_store %arg10[%c0_70, %c0_71], %119 {strides = array<i32>} : memref<4x256xf32, #tpu.memory_space<vmem>>, vector<4x256xf32>,
    %c7 = arith.constant 7 : index
    %c0_72 = arith.constant 0 : index
    %c0_73 = arith.constant 0 : index
    %121 = vector.load %arg5[%c7, %c0_72, %c0_73] : memref<9x4x4xf32, #tpu.memory_space<vmem>>, vector<1x4x4xf32>
    %122 = vector.shape_cast %121 : vector<1x4x4xf32> to vector<4x4xf32>
    %cst_74 = arith.constant dense<0.000000e+00> : vector<4x256xf32>
    %123 = tpu.matmul %122, %56, %cst_74 {dimension_numbers = #tpu.dot_dimension_numbers<[1], [0], [0], [1], [0, 0, 1, 1], [], []>} : vector<4x4xf32>, vector<4x256xf32>, vector<4x256xf32> -> vector<4x256xf32>
    %c0_75 = arith.constant 0 : index
    %c0_76 = arith.constant 0 : index
    %124 = vector.load %arg10[%c0_75, %c0_76] : memref<4x256xf32, #tpu.memory_space<vmem>>, vector<4x256xf32>
    %125 = arith.addf %124, %123 : vector<4x256xf32>
    %c0_77 = arith.constant 0 : index
    %c0_78 = arith.constant 0 : index
    %126 = vector.load %arg10[%c0_77, %c0_78] : memref<4x256xf32, #tpu.memory_space<vmem>>, vector<4x256xf32>
    tpu.vector_store %arg10[%c0_77, %c0_78], %125 {strides = array<i32>} : memref<4x256xf32, #tpu.memory_space<vmem>>, vector<4x256xf32>,
    %c8 = arith.constant 8 : index
    %c0_79 = arith.constant 0 : index
    %c0_80 = arith.constant 0 : index
    %127 = vector.load %arg5[%c8, %c0_79, %c0_80] : memref<9x4x4xf32, #tpu.memory_space<vmem>>, vector<1x4x4xf32>
    %128 = vector.shape_cast %127 : vector<1x4x4xf32> to vector<4x4xf32>
    %cst_81 = arith.constant dense<0.000000e+00> : vector<4x256xf32>
    %129 = tpu.matmul %128, %114, %cst_81 {dimension_numbers = #tpu.dot_dimension_numbers<[1], [0], [0], [1], [0, 0, 1, 1], [], []>} : vector<4x4xf32>, vector<4x256xf32>, vector<4x256xf32> -> vector<4x256xf32>
    %c0_82 = arith.constant 0 : index
    %c0_83 = arith.constant 0 : index
    %130 = vector.load %arg10[%c0_82, %c0_83] : memref<4x256xf32, #tpu.memory_space<vmem>>, vector<4x256xf32>
    %131 = arith.addf %130, %129 : vector<4x256xf32>
    %c0_84 = arith.constant 0 : index
    %c0_85 = arith.constant 0 : index
    %132 = vector.load %arg10[%c0_84, %c0_85] : memref<4x256xf32, #tpu.memory_space<vmem>>, vector<4x256xf32>
    tpu.vector_store %arg10[%c0_84, %c0_85], %131 {strides = array<i32>} : memref<4x256xf32, #tpu.memory_space<vmem>>, vector<4x256xf32>,
    %c0_86 = arith.constant 0 : index
    %c0_87 = arith.constant 0 : index
    %133 = vector.load %arg10[%c0_86, %c0_87] : memref<4x256xf32, #tpu.memory_space<vmem>>, vector<4x256xf32>
    %c0_88 = arith.constant 0 : index
    %c0_89 = arith.constant 0 : index
    %134 = vector.load %arg6[%c0_88, %c0_89] : memref<4x1xf32, #tpu.memory_space<vmem>>, vector<4x1xf32>
    %c0_90 = arith.constant 0 : index
    %c0_91 = arith.constant 0 : index
    %135 = vector.load %arg7[%c0_90, %c0_91] : memref<4x1xf32, #tpu.memory_space<vmem>>, vector<4x1xf32>
    %cst_92 = arith.constant dense<0.000000e+00> : vector<4xf32>
    %136 = vector.multi_reduction <add>, %133, %cst_92 [1] : vector<4x256xf32> to vector<4xf32>
    %137 = vector.shape_cast %136 : vector<4xf32> to vector<4x1xf32>
    %cst_93 = arith.constant 3.906250e-03 : f32
    %138 = vector.broadcast %cst_93 : f32 to vector<4x1xf32>
    %139 = arith.mulf %137, %138 : vector<4x1xf32>
    %140 = arith.mulf %133, %133 : vector<4x256xf32>
    %cst_94 = arith.constant dense<0.000000e+00> : vector<4xf32>
    %141 = vector.multi_reduction <add>, %140, %cst_94 [1] : vector<4x256xf32> to vector<4xf32>
    %142 = vector.shape_cast %141 : vector<4xf32> to vector<4x1xf32>
    %cst_95 = arith.constant 3.906250e-03 : f32
    %143 = vector.broadcast %cst_95 : f32 to vector<4x1xf32>
    %144 = arith.mulf %142, %143 : vector<4x1xf32>
    %145 = arith.mulf %139, %139 : vector<4x1xf32>
    %146 = arith.subf %144, %145 : vector<4x1xf32>
    %cst_96 = arith.constant 0.000000e+00 : f32
    %147 = vector.broadcast %cst_96 : f32 to vector<4x1xf32>
    %148 = arith.maximumf %146, %147 : vector<4x1xf32>
    %149 = vector.broadcast %139 : vector<4x1xf32> to vector<4x256xf32>
    %150 = arith.subf %133, %149 : vector<4x256xf32>
    %cst_97 = arith.constant 9.99999974E-6 : f32
    %151 = vector.broadcast %cst_97 : f32 to vector<4x1xf32>
    %152 = arith.addf %148, %151 : vector<4x1xf32>
    %153 = math.rsqrt %152 : vector<4x1xf32>
    %154 = arith.mulf %153, %134 : vector<4x1xf32>
    %155 = vector.broadcast %154 : vector<4x1xf32> to vector<4x256xf32>
    %156 = arith.mulf %150, %155 : vector<4x256xf32>
    %157 = vector.broadcast %135 : vector<4x1xf32> to vector<4x256xf32>
    %158 = arith.addf %156, %157 : vector<4x256xf32>
    %cst_98 = arith.constant 0.000000e+00 : f32
    %159 = vector.broadcast %cst_98 : f32 to vector<4x256xf32>
    %160 = arith.cmpf oge, %158, %159 : vector<4x256xf32>
    %cst_99 = arith.constant 0.00999999977 : f32
    %161 = vector.broadcast %cst_99 : f32 to vector<4x256xf32>
    %162 = arith.mulf %161, %158 : vector<4x256xf32>
    %163 = arith.select %160, %158, %162 : vector<4x256xi1>, vector<4x256xf32>
    %c0_100 = arith.constant 0 : index
    %c0_101 = arith.constant 0 : index
    %c0_102 = arith.constant 0 : index
    %164 = vector.load %arg9[%c0_100, %c0_101, %c0_102] : memref<1x4x256xf32, #tpu.memory_space<vmem>>, vector<1x4x256xf32>
    %165 = vector.shape_cast %164 : vector<1x4x256xf32> to vector<4x256xf32>
    %166 = vector.shape_cast %163 : vector<4x256xf32> to vector<1x4x256xf32>
    tpu.vector_store %arg9[%c0_100, %c0_101, %c0_102], %166 {strides = array<i32>} : memref<1x4x256xf32, #tpu.memory_space<vmem>>, vector<1x4x256xf32>,
    return
  }
  func.func @transform_0(%arg0: i32) -> (i32, i32, i32) {
    %c0_i32 = arith.constant 0 : i32
    %c0_i32_0 = arith.constant 0 : i32
    %c0_i32_1 = arith.constant 0 : i32
    return %arg0, %c0_i32, %c0_i32_0 : i32, i32, i32
  }
  func.func @transform_1(%arg0: i32) -> (i32, i32, i32) {
    %c0_i32 = arith.constant 0 : i32
    %c0_i32_0 = arith.constant 0 : i32
    %c0_i32_1 = arith.constant 0 : i32
    return %arg0, %c0_i32, %c0_i32_0 : i32, i32, i32
  }
  func.func @transform_2(%arg0: i32) -> (i32, i32) {
    %c0_i32 = arith.constant 0 : i32
    %c0_i32_0 = arith.constant 0 : i32
    %c0_i32_1 = arith.constant 0 : i32
    return %c0_i32, %c0_i32_0 : i32, i32
  }
  func.func @transform_3(%arg0: i32) -> (i32, i32) {
    %c0_i32 = arith.constant 0 : i32
    %c0_i32_0 = arith.constant 0 : i32
    %c0_i32_1 = arith.constant 0 : i32
    return %c0_i32, %c0_i32_0 : i32, i32
  }
  func.func @transform_4(%arg0: i32) -> (i32, i32, i32) {
    %c0_i32 = arith.constant 0 : i32
    %c0_i32_0 = arith.constant 0 : i32
    %c0_i32_1 = arith.constant 0 : i32
    %c0_i32_2 = arith.constant 0 : i32
    return %c0_i32, %c0_i32_0, %c0_i32_1 : i32, i32, i32
  }
  func.func @transform_5(%arg0: i32) -> (i32, i32) {
    %c0_i32 = arith.constant 0 : i32
    %c0_i32_0 = arith.constant 0 : i32
    %c0_i32_1 = arith.constant 0 : i32
    return %c0_i32, %c0_i32_0 : i32, i32
  }
  func.func @transform_6(%arg0: i32) -> (i32, i32) {
    %c0_i32 = arith.constant 0 : i32
    %c0_i32_0 = arith.constant 0 : i32
    %c0_i32_1 = arith.constant 0 : i32
    return %c0_i32, %c0_i32_0 : i32, i32
  }
  func.func @transform_7(%arg0: i32) -> i32 {
    %c0_i32 = arith.constant 0 : i32
    %c0_i32_0 = arith.constant 0 : i32
    return %c0_i32 : i32
  }
  func.func @transform_8(%arg0: i32) -> (i32, i32, i32) {
    %c0_i32 = arith.constant 0 : i32
    %c0_i32_0 = arith.constant 0 : i32
    %c0_i32_1 = arith.constant 0 : i32
    return %arg0, %c0_i32, %c0_i32_0 : i32, i32, i32
  }
}

</mosaic_0001>

<bundles_post_ra>
// kernel: tpu_custom_call.1
= control target key start
LH: loop header
LB: loop body
LE: loop exit
PB: predicated region body
PF: predicated region fallthrough
CT: control target
= control target key end

     0   :  { %s1985_s0 = inlined_call_operand.vmem [shape: f32[2,4,256], index: 0, kind: input, shape index: {}]   ;;  %s1986_s1 = inlined_call_operand.vmem [shape: f32[2,4,256], index: 1, kind: input, shape index: {}]   ;;  %s1987_s2 = inlined_call_operand.vmem [shape: f32[4,1], index: 2, kind: input, shape index: {}]   ;;  %s1988_s3 = inlined_call_operand.vmem [shape: f32[4,1], index: 3, kind: input, shape index: {}]   ;;  %s1989_s4 = inlined_call_operand.vmem [shape: f32[9,4,4], index: 4, kind: input, shape index: {}]   ;;  %s1990_s5 = inlined_call_operand.vmem [shape: f32[4,1], index: 5, kind: input, shape index: {}]   ;;  %s1991_s6 = inlined_call_operand.vmem [shape: f32[4,1], index: 6, kind: input, shape index: {}]   ;;  %s1992_s7 = inlined_call_operand.<no memory space> [shape: f32[1], index: 7, kind: input, shape index: {}]   ;;  %s1993_s8 = inlined_call_operand.hbm [shape: f32[2,4,256], index: 8, kind: output, shape index: {}]  }
   0x1   :  { %13 = sst [smem:[#allocation3]] %s1992_s7 }
   0x2   :  { %14 = vsyncpa [#allocation5], 0 }
   0x3   :  { %16 = vsyncpa [#allocation5 + $0x1], 0  ;;  %s1673_s29 = smov 0   ;;  %s1675_s30 = smov 0  }
   0x4   :  { %s1677_s9 = smov 0   ;;  %s1679_s10 = smov 0  }
   0x5 LB: > { %s1694_s7 = sadd.s32 4294967295, %s1615_s10   ;;  %s1448_s11 = sadd.s32 4294967294, %s1615_s10   ;;  %s1615_s10 = sphi %s1679_s10, %s2007_s10   ;;  %s1611_s9 = sphi %s1677_s9, %s2006_s9   ;;  %s1607_s30 = sphi %s1675_s30, %s2005_s30   ;;  %s1603_s29 = sphi %s1673_s29, %s2004_s29  }
   0x6   : > { %s1698_s12 = sadd.s32 1, %s1615_s10   ;;  %s207_s13 = sadd.s32 1, %s1611_s9 }
   0x7   : > { %s204_s14 = ssub.s32 %s1615_s10, %s1698_s12  ;;  %p217_p0 = scmp.ne.s32.totalorder %s1611_s9, %s1607_s30 }
   0x8   : > { %p205_p1 = scmp.eq.s32.totalorder %s204_s14, 0  ;;  %p218_p2 = scmp.eq.s32.totalorder %s1694_s7, 1 }
   0x9   : > { %p223_p3 = scmp.ne.s32.totalorder %s1607_s30, %s1603_s29  ;;  %p224_p4 = scmp.eq.s32.totalorder %s1448_s11, 1 }
   0xa   : > { %s1709_s15 = scalar_select %p205_p1, %s1611_s9, %s207_s13  }
   0xb   : > { %p1711_p5 = por %p218_p2, %p217_p0  ;;  %p1715_p6 = por %p224_p4, %p223_p3 }
   0xc   : > { %p1451_p7 = scmp.ge.s32.totalorder %s1615_s10, 1  ;;  %p276_p8 = scmp.lt.s32.totalorder %s1615_s10, 3 }
   0xe   : > { %p277_p9 = pnand %p1451_p7, %p276_p8 }
   0xf   : > { %p315_p10 = scmp.lt.s32.totalorder (!%p277_p9), %s1694_s7, 1  ;;  %vm332_vm0 = vcmask (!%p277_p9), 1043456   ;;  %v1617_v10 = vmov (!%p277_p9), 0   ;;  %v327_v19 = vld [vmem:[%s1987_s2] sm:$0xf] (!%p277_p9)  ;;  %v356_v25 = vlaneseq (!%p277_p9)  ;;  %s391_s27 = sld [smem:[#allocation3]] (!%p277_p9) }
  0x10   : > { %280 = sbr.rel (%p277_p9) target bundleno = 1143 (0x477), region = 52  ;;  %1546 = vset.pattern.permute.xlu1 (!%p277_p9), %v1617_v10  ;;  %1547 = vset.pattern.permute.xlu0 (!%p277_p9), %v1617_v10  ;;  %v328_v22 = vld [vmem:[%s1988_s3] sm:$0xf] (!%p277_p9)  ;;  %v1618_v23 = vmov (!%p277_p9), 839922192   ;;  %s1619_s14 = smov (!%p277_p9), 112  }
  0x11   : > { %v354_v24 = vunpack.c.l.s4 (!%p277_p9), %v1618_v23  ;;  %v357_v27 = vshrl.u32 (!%p277_p9), %v356_v25, 7  ;;  %v1765_v44 = vand.u32 (!%p277_p9), 127, %v356_v25  ;;  %s1622_s20 = smov (!%p277_p9), 127   ;;  %v1623_v50 = vmov (!%p277_p9), 0.0   ;;  %v1460_v54 = vld [vmem:[%s1989_s4 + $0x4] sm:$0xf] (!%p277_p9) }
  0x12   : > { %540 = vmatprep.mubr.f32.mxu0 (!%p277_p9), %v1623_v50  ;;  %627 = vmatprep.mubr.f32.mxu1 (!%p277_p9), %v1623_v50  ;;  %vm466_vm4 = vcmask (!%p277_p9), 31744   ;;  %v1468_v25 = vld [vmem:[%s1989_s4 + $0xc] sm:$0xf] (!%p277_p9)  ;;  %s312_s11 = sand.u32 (!%p277_p9), 1, %s1607_s30  }
  0x13   : > { %v355_v26 = vunpack.c.0.s8 (!%p277_p9), %v354_v24  ;;  %vm401_vm2 = vcmp.lt.s32.totalorder (!%p277_p9), %v1765_v44, 16  ;;  %vm424_vm3 = vcmp.lt.s32.totalorder (!%p277_p9), %v1765_v44, 112  ;;  %v400_v49 = vadd.s32 (!%p277_p9), 128, %v1765_v44  ;;  %v1464_v24 = vld [vmem:[%s1989_s4 + $0x8] sm:$0xf] (!%p277_p9)  ;;  %s1363_s23 = scalar_lea.sflag (!%p277_p9), [#allocation5], %s312_s11 }
  0x14   : > { %v405_v62 = vand.u32 (!%p277_p9), 15, %v1765_v44  ;;  %vm450_vm6 = vcmp.lt.s32.totalorder (!%p277_p9), %v1765_v44, 127  ;;  %vm443_vm9 = vcmp.lt.s32.totalorder (!%p277_p9), %v1765_v44, 1  ;;  %v1488_v44 = vld [vmem:[%s1989_s4 + $0x20] sm:$0xf] (!%p277_p9) }
  0x15   : > { %v1741_v28 = vsub.s32 (!%p277_p9), %v355_v26, %v357_v27  ;;  %v392_v33 = vstv (!%p277_p9), %s391_s27  ;;  %vm404_vm5 = vcmp.ge.s32.totalorder (!%p277_p9), %v400_v49, 240  ;;  %v406_v63 = vand.u32 (!%p277_p9), 15, %v400_v49 }
  0x16   : > { %vm1806_vm8 = vcmp.eq.s32.totalorder (!%p277_p9), %v405_v62, 0  ;;  %vm1823_vm11 = vcmp.eq.s32.totalorder (!%p277_p9), %v405_v62, 15 }
  0x17   : > { %s1723_s18 = scalar_select %p315_p10, %s1694_s7, 1  ;;  %vm1802_vm7 = vcmp.eq.s32.totalorder %v406_v63, 0  ;;  %vm1811_vm10 = vcmp.eq.s32.totalorder %v406_v63, 15 }
  0x19   : > { %s1497_s19 = sshll.u32 %s1723_s18, 3  ;;  %s1620_s18 = smov 16  }
  0x1a   : > { %s319_s22 = scalar_lea.vmem %s1985_s0, %s1497_s19  ;;  %s324_s13 = scalar_lea.vmem %s1986_s1, %s1497_s19 }
  0x1b   : > { %v325_v0 = vld [vmem:[%s319_s22] sm:$0xff]  ;;  %s1621_s19 = smov 1  }
  0x1c   : > { %v330_v1 = vcombine.high %v325_v0, %v325_v0  ;;  %v333_v2 = vsel %vm332_vm0, %v325_v0, 0.0  ;;  %v339_v3 = vmul.f32 %v325_v0, %v325_v0  ;;  %v326_v32 = vld [vmem:[%s324_s13] sm:$0xff]  ;;  %s1452_s13 = sshll.u32 %s312_s11, 3 }
  0x1d   : > { %v393_v37 = vmul.f32 %v392_v33, %v326_v32 }
  0x1e   : > { %v334_v4 = vsel %vm332_vm0, %v330_v1, 0.0  ;;  %v341_v5 = vcombine.high %v339_v3, %v339_v3  ;;  %v343_v6 = vsel %vm332_vm0, %v339_v3, 0.0 }
  0x1f   : > { %v335_v7 = vadd.f32 %v334_v4, %v333_v2 }
  0x20   : > { %v344_v8 = vsel %vm332_vm0, %v341_v5, 0.0 }
  0x21   : > { %336 = vadd.xlane.f32.xlu0 %v335_v7  ;;  %v345_v9 = vadd.f32 %v344_v8, %v343_v6 }
  0x25   : > { %346 = vadd.xlane.f32.xlu0 %v345_v9 }
  0xae   : > { %v337_v11 = vpop.xlane.xlu0 %336 }
  0xaf   : > { %v338_v12 = vmul.f32 0.00390625, %v337_v11 }
  0xb1   : > { %v349_v14 = vmul.f32 %v338_v12, %v338_v12  ;;  %v359_v29 = vrot.slane %v338_v12, %v1741_v28 }
  0xb2   : > { %v347_v13 = vpop.xlane.xlu0 %346 }
  0xb3   : > { %v348_v15 = vmul.f32 0.00390625, %v347_v13  ;;  %v361_v34 = vsub.f32 %v325_v0, %v359_v29  ;;  %v465_v13 = vld [vmem:[%s1989_s4] sm:$0xf] }
  0xb5   : > { %v350_v16 = vsub.f32 %v348_v15, %v349_v14 }
  0xb7   : > { %v351_v17 = vmax.f32 %v350_v16, 0.0 }
  0xb9   : > { %v362_v18 = vadd.f32 1e-05, %v351_v17 }
  0xbb   : > { %1549 = vrsqrt.f32 %v362_v18 }
  0xc5   : > { %v1550_v20 = vpop.eup %1549 }
  0xc6   : > { %v364_v21 = vmul.f32 %v1550_v20, %v327_v19 }
  0xc8   : > { %367 = vperm.xlu1 %1546, %v364_v21  }
  0xcc   : > { %380 = vperm.xlu1 %1546, %v328_v22  }
 0x147   : > { %v368_v30 = vpop.permute.xlu1 %367 }
 0x148   : > { %v375_v31 = vrot.slane %v368_v30, %v1741_v28  ;;  %v1472_v30 = vld [vmem:[%s1989_s4 + $0x10] sm:$0xf] }
 0x14a   : > { %v377_v36 = vmul.f32 %v375_v31, %v361_v34  ;;  %v1476_v31 = vld [vmem:[%s1989_s4 + $0x14] sm:$0xf] }
 0x14b   : > { %v381_v35 = vpop.permute.xlu1 %380 }
 0x14c   : > { %v388_v38 = vrot.slane %v381_v35, %v1741_v28 }
 0x14e   : > { %v390_v39 = vadd.f32 %v388_v38, %v377_v36 }
 0x150   : > { %v394_v40 = vadd.f32 %v393_v37, %v390_v39 }
 0x152   : > { %vm395_vm1 = vcmp.ge.f32.partialorder %v394_v40, 0.0  ;;  %v396_v41 = vmul.f32 0.01, %v394_v40 }
 0x154   : > { %v1751_v42 = vsel %vm395_vm1, %v394_v40, %v396_v41  ;;  %v1480_v40 = vld [vmem:[%s1989_s4 + $0x18] sm:$0xf]  ;;  %v1484_v41 = vld [vmem:[%s1989_s4 + $0x1c] sm:$0xf] }
 0x155   : > { %420 = vrot.lane.b32.xlu1 %v1751_v42, %s1619_s14  ;;  %414 = vrot.lane.b32.xlu0 %v1751_v42, %s1620_s18  ;;  %v1757_v43 = vcombine.high %v1751_v42, %v1751_v42 }
 0x159   : > { %732 = vrot.lane.b32.xlu0 %v1757_v43, %s1621_s19  ;;  %416 = vrot.lane.b32.xlu1 %v1757_v43, %s1620_s18  ;;  %s314_s18 = scalar_lea.vmem [#allocation4], %s1452_s13 }
 0x15d   : > { %422 = vrot.lane.b32.xlu1 %v1757_v43, %s1619_s14  ;;  %s1499_s14 = sshll.u32 %s1694_s7, 7  ;;  %s1624_s7 = smov [#allocation4]  }
 0x15e   : > { %s1943_s22 = scalar_lea.hbm %s1993_s8, %s1499_s14  ;;  %s1557_s25 = sshll.u32 %s1624_s7, 4  ;;  %s1558_s25 = int_to_ptr.vmem [resolvable:$false] %s1557_s25 }
 0x15f   : > { %s1559_s26 = scalar_lea.vmem %s1558_s25, 256 }
 0x161   : > { %730 = vrot.lane.b32.xlu1 %v1751_v42, %s1621_s19 }
 0x1c7   : > { %v421_v45 = vpop.permute.xlu1 %420  ;;  %v415_v46 = vpop.permute.xlu0 %414 }
 0x1cb   : > { %v417_v47 = vpop.permute.xlu1 %416  ;;  %v733_v59 = vpop.permute.xlu0 %732 }
 0x1cc   : > { %v418_v48 = vsel %vm401_vm2, %v415_v46, %v417_v47  ;;  %v419_v52 = vsel %vm401_vm2, %v417_v47, %v415_v46 }
 0x1cd   : > { %448 = vrot.lane.b32.xlu0 %v418_v48, %s1622_s20  ;;  %441 = vrot.lane.b32.xlu1 %v418_v48, %s1621_s19 }
 0x1ce   : > { %1461 = vmatprep.subr.msk.mxu1 %vm332_vm0, %v418_v48 }
 0x1cf   : > { %v423_v51 = vpop.permute.xlu1 %422 }
 0x1d0   : > { %v1778_v53 = vsel %vm424_vm3, %v421_v45, %v423_v51  ;;  %v426_v55 = vsel %vm424_vm3, %v423_v51, %v421_v45 }
 0x1d1   : > { %738 = vrot.lane.b32.xlu0 %v1757_v43, %s1622_s20  ;;  %v431_v56 = vsel %vm401_vm2, %v1778_v53, %v419_v52  ;;  %v1790_v57 = vsel %vm404_vm5, %v418_v48, %v426_v55 }
 0x1d2   : > { %439 = vrot.lane.b32.xlu1 %v431_v56, %s1621_s19  ;;  %1462 = vmatpush1.msk.msra.mxu1 %vm332_vm0, %v431_v56 }
 0x1d3   : > { %1463 = vmatmul.mubr.msk.f32.vlgmr.msra.gmra.mrb[0].mxu1 %vm466_vm4, %v1460_v54  ;;  %v731_v58 = vpop.permute.xlu1 %730 }
 0x1d4   : > { %821 = vmatprep.mubr.f32.mxu1 %v1623_v50  ;;  %v734_v14 = vsel %vm443_vm9, %v731_v58, %v733_v59  ;;  %v735_v15 = vsel %vm443_vm9, %v733_v59, %v731_v58 }
 0x1d5   : > { %1013 = vrot.lane.b32.xlu0 %v1790_v57, %s1621_s19 }
 0x1d6   : > { %446 = vrot.lane.b32.xlu1 %v431_v56, %s1622_s20 }
 0x1d9   : > { %1019 = vrot.lane.b32.xlu0 %v1790_v57, %s1622_s20 }
 0x1da   : > { %736 = vrot.lane.b32.xlu1 %v1751_v42, %s1622_s20 }
 0x1de   : > { %1011 = vrot.lane.b32.xlu1 %v1778_v53, %s1621_s19  ;;  %s1377_s19 = sshll.u32 %s314_s18, 4  ;;  %s1945_s19 = int_to_ptr.vmem [resolvable:$true] %s1377_s19 }
 0x1df   : > { %s1553_s24 = scalar_lea.vmem %s1945_s19, 128  ;;  %p1560_p0 = scmp.lt.s32.totalorder %s1945_s19, %s1558_s25 }
 0x1e0   : > { %p1554_p11 = scmp.ne.s32.totalorder %s1945_s19, %s1553_s24  ;;  %p1561_p1 = scmp.lt.s32.totalorder %s1559_s26, %s1553_s24 }
 0x1e2   : > { %1017 = vrot.lane.b32.xlu1 %v1778_v53, %s1622_s20  ;;  %p1555_p12 = pnand %p1554_p11, %p1711_p5  ;;  %p1562_p2 = por %p1561_p1, %p1560_p0 }
 0x1e4   : > { %p1556_p13 = pneg %p1555_p12 }
 0x1e6   : > { %p1563_p3 = pnand %p1562_p2, %p1556_p13 }
 0x23f   : > { %v442_v60 = vpop.permute.xlu1 %441  ;;  %v449_v61 = vpop.permute.xlu0 %448 }
 0x243   : > { %v739_v3 = vpop.permute.xlu0 %738 }
 0x244   : > { %v440_v0 = vpop.permute.xlu1 %439 }
 0x245   : > { %v444_v6 = vsel %vm443_vm9, %v440_v0, %v442_v60  ;;  %v445_v7 = vsel %vm443_vm9, %v442_v60, %v440_v0 }
 0x247   : > { %v1014_v21 = vpop.permute.xlu0 %1013 }
 0x248   : > { %v447_v4 = vpop.permute.xlu1 %446 }
 0x249   : > { %v451_v8 = vsel %vm450_vm6, %v447_v4, %v449_v61  ;;  %v452_v9 = vsel %vm450_vm6, %v449_v61, %v447_v4 }
 0x24a   : > { %v458_v11 = vsel %vm1802_vm7, %v452_v9, %v444_v6  ;;  %v457_v12 = vsel %vm1806_vm8, %v451_v8, %v445_v7  ;;  %v464_v17 = vsel %vm1811_vm10, %v444_v6, %v452_v9  ;;  %v463_v18 = vsel %vm1823_vm11, %v445_v7, %v451_v8 }
 0x24b   : > { %1457 = vmatprep.subr.msk.mxu0 %vm332_vm0, %v458_v11  ;;  %v1020_v32 = vpop.permute.xlu0 %1019 }
 0x24c   : > { %1458 = vmatpush1.msk.msra.mxu0 %vm332_vm0, %v457_v12  ;;  %v737_v16 = vpop.permute.xlu1 %736 }
 0x24d   : > { %v740_v19 = vsel %vm450_vm6, %v737_v16, %v739_v3  ;;  %v741_v20 = vsel %vm450_vm6, %v739_v3, %v737_v16  ;;  %1459 = vmatmul.mubr.msk.f32.vlgmr.msra.gmra.mrb[0].mxu0 %vm466_vm4, %v465_v13  ;;  %1465 = vmatprep.subr.msk.mxu0 %vm332_vm0, %v464_v17 }
 0x24e   : > { %v742_v22 = vsel %vm1806_vm8, %v740_v19, %v735_v15  ;;  %1466 = vmatpush1.msk.msra.mxu0 %vm332_vm0, %v463_v18  ;;  %v743_v23 = vsel %vm1802_vm7, %v741_v20, %v734_v14  ;;  %716 = vmatprep.mubr.f32.mxu0 %v1623_v50  ;;  %v745_v27 = vsel %vm1811_vm10, %v734_v14, %v741_v20 }
 0x24f   : > { %1469 = vmatprep.subr.msk.mxu1 %vm332_vm0, %v743_v23  ;;  %1473 = vmatprep.subr.msk.mxu0 %vm332_vm0, %v1757_v43  ;;  %v744_v29 = vsel %vm1823_vm11, %v735_v15, %v740_v19 }
 0x250   : > { %1470 = vmatpush1.msk.msra.mxu1 %vm332_vm0, %v742_v22  ;;  %v1012_v26 = vpop.permute.xlu1 %1011 }
 0x251   : > { %1467 = vmatmul.mubr.msk.f32.vlgmr.msra.gmra.mrb[2].mxu0 %vm466_vm4, %v1464_v24  ;;  %1471 = vmatmul.mubr.msk.f32.vlgmr.msra.gmra.mrb[2].mxu1 %vm466_vm4, %v1468_v25  ;;  %v1015_v33 = vsel %vm443_vm9, %v1012_v26, %v1014_v21  ;;  %v1016_v35 = vsel %vm443_vm9, %v1014_v21, %v1012_v26  ;;  %v1296_v25 = vld [vmem:[%s1991_s6] sm:$0xf] }
 0x252   : > { %1474 = vmatpush1.msk.msra.mxu0 %vm332_vm0, %v1751_v42  ;;  %1477 = vmatprep.subr.msk.mxu1 %vm332_vm0, %v745_v27 }
 0x253   : > { %1478 = vmatpush1.msk.msra.mxu1 %vm332_vm0, %v744_v29  ;;  %908 = vmatprep.mubr.f32.mxu0 %v1623_v50 }
 0x254   : > { %1485 = vmatprep.subr.msk.mxu1 %vm332_vm0, %v1790_v57  ;;  %997 = vmatprep.mubr.f32.mxu1 %v1623_v50  ;;  %v1018_v34 = vpop.permute.xlu1 %1017 }
 0x255   : > { %v1021_v36 = vsel %vm450_vm6, %v1018_v34, %v1020_v32  ;;  %v1022_v37 = vsel %vm450_vm6, %v1020_v32, %v1018_v34  ;;  %1475 = vmatmul.mubr.msk.f32.vlgmr.msra.gmra.mrb[4].mxu0 %vm466_vm4, %v1472_v30  ;;  %1479 = vmatmul.mubr.msk.f32.vlgmr.msra.gmra.mrb[4].mxu1 %vm466_vm4, %v1476_v31 }
 0x256   : > { %v1023_v38 = vsel %vm1806_vm8, %v1021_v36, %v1016_v35  ;;  %1486 = vmatpush1.msk.msra.mxu1 %vm332_vm0, %v1778_v53  ;;  %v1024_v39 = vsel %vm1802_vm7, %v1022_v37, %v1015_v33  ;;  %1102 = vmatprep.mubr.f32.mxu0 %v1623_v50  ;;  %v1026_v42 = vsel %vm1811_vm10, %v1015_v33, %v1022_v37 }
 0x257   : > { %1481 = vmatprep.subr.msk.mxu0 %vm332_vm0, %v1024_v39  ;;  %1191 = vmatprep.mubr.f32.mxu1 %v1623_v50  ;;  %v1025_v43 = vsel %vm1823_vm11, %v1016_v35, %v1021_v36  ;;  %v1295_v35 = vld [vmem:[%s1990_s5] sm:$0xf] }
 0x258   : > { %1482 = vmatpush1.msk.msra.mxu0 %vm332_vm0, %v1023_v38 }
 0x259   : > { %1483 = vmatmul.mubr.msk.f32.vlgmr.msra.gmra.mrb[6].mxu0 %vm466_vm4, %v1480_v40  ;;  %1489 = vmatprep.subr.msk.mxu0 %vm332_vm0, %v1026_v42 }
 0x25a   : > { %1490 = vmatpush1.msk.msra.mxu0 %vm332_vm0, %v1025_v43  ;;  %1487 = vmatmul.mubr.msk.f32.vlgmr.msra.gmra.mrb[6].mxu1 %vm466_vm4, %v1484_v41 }
 0x25b   : > { %1280 = vmatprep.mubr.f32.mxu0 %v1623_v50 }
 0x25d   : > { %1491 = vmatmul.mubr.msk.f32.vlgmr.msra.gmra.mrb[8].mxu0 %vm466_vm4, %v1488_v44 }
 0x2a6   : > { %v629_v45 = vpop.f32.mrb[0].mxu1 }
 0x2a7   : > { %v631_v46 = vpop.f32.mrb[1].mxu1 }
 0x2a8   : > { %v637_v47 = vcombine.low %v629_v45, %v631_v46 }
 0x320   : > { %v542_v48 = vpop.f32.mrb[0].mxu0 }
 0x321   : > { %v544_v49 = vpop.f32.mrb[1].mxu0 }
 0x322   : > { %v549_v51 = vcombine.low %v542_v48, %v544_v49 }
 0x324   : > { %v639_v52 = vadd.f32 %v637_v47, %v549_v51  ;;  %v718_v53 = vpop.f32.mrb[2].mxu0  ;;  %v823_v54 = vpop.f32.mrb[2].mxu1 }
 0x325   : > { %v720_v55 = vpop.f32.mrb[3].mxu0  ;;  %v825_v56 = vpop.f32.mrb[3].mxu1 }
 0x326   : > { %v726_v57 = vcombine.low %v718_v53, %v720_v55  ;;  %v831_v58 = vcombine.low %v823_v54, %v825_v56 }
 0x328   : > { %v728_v59 = vadd.f32 %v726_v57, %v639_v52  ;;  %v910_v60 = vpop.f32.mrb[4].mxu0  ;;  %v999_v61 = vpop.f32.mrb[4].mxu1 }
 0x329   : > { %v912_v62 = vpop.f32.mrb[5].mxu0  ;;  %v1001_v50 = vpop.f32.mrb[5].mxu1 }
 0x32a   : > { %v833_v63 = vadd.f32 %v831_v58, %v728_v59  ;;  %v918_v0 = vcombine.low %v910_v60, %v912_v62  ;;  %v1007_v1 = vcombine.low %v999_v61, %v1001_v50 }
 0x32c   : > { %v920_v2 = vadd.f32 %v918_v0, %v833_v63  ;;  %v1104_v3 = vpop.f32.mrb[6].mxu0 }
 0x32d   : > { %v1106_v4 = vpop.f32.mrb[7].mxu0  ;;  %v1193_v5 = vpop.f32.mrb[6].mxu1 }
 0x32e   : > { %v1009_v6 = vadd.f32 %v1007_v1, %v920_v2  ;;  %v1112_v7 = vcombine.low %v1104_v3, %v1106_v4  ;;  %v1195_v8 = vpop.f32.mrb[7].mxu1 }
 0x32f   : > { %v1201_v9 = vcombine.low %v1193_v5, %v1195_v8 }
 0x330   : > { %v1114_v10 = vadd.f32 %v1112_v7, %v1009_v6  ;;  %v1282_v11 = vpop.f32.mrb[8].mxu0 }
 0x331   : > { %v1284_v12 = vpop.f32.mrb[9].mxu0 }
 0x332   : > { %v1203_v13 = vadd.f32 %v1201_v9, %v1114_v10  ;;  %v1290_v14 = vcombine.low %v1282_v11, %v1284_v12 }
 0x334   : > { %v1292_v15 = vadd.f32 %v1290_v14, %v1203_v13 }
 0x336   : > { %v1298_v16 = vcombine.high %v1292_v15, %v1292_v15  ;;  %v1306_v17 = vmul.f32 %v1292_v15, %v1292_v15  ;;  %v1300_v18 = vsel %vm332_vm0, %v1292_v15, 0.0 }
 0x338   : > { %v1301_v19 = vsel %vm332_vm0, %v1298_v16, 0.0  ;;  %v1308_v20 = vcombine.high %v1306_v17, %v1306_v17  ;;  %v1310_v22 = vsel %vm332_vm0, %v1306_v17, 0.0 }
 0x339   : > { %v1302_v21 = vadd.f32 %v1301_v19, %v1300_v18 }
 0x33a   : > { %v1311_v23 = vsel %vm332_vm0, %v1308_v20, 0.0 }
 0x33b   : > { %1303 = vadd.xlane.f32.xlu1 %v1302_v21  ;;  %v1312_v24 = vadd.f32 %v1311_v23, %v1310_v22 }
 0x33d   : > { %1313 = vadd.xlane.f32.xlu0 %v1312_v24 }
 0x34c   : > { %1347 = vperm.xlu1 %1546, %v1296_v25  }
 0x3c8   : > { %v1304_v26 = vpop.xlane.xlu1 %1303 }
 0x3c9   : > { %v1305_v27 = vmul.f32 0.00390625, %v1304_v26 }
 0x3ca   : > { %v1314_v29 = vpop.xlane.xlu0 %1313 }
 0x3cb   : > { %v1316_v30 = vmul.f32 %v1305_v27, %v1305_v27  ;;  %v1315_v31 = vmul.f32 0.00390625, %v1314_v29  ;;  %v1326_v38 = vrot.slane %v1305_v27, %v1741_v28 }
 0x3cc   : > { %v1348_v39 = vpop.permute.xlu1 %1347 }
 0x3cd   : > { %v1317_v32 = vsub.f32 %v1315_v31, %v1316_v30  ;;  %v1328_v41 = vsub.f32 %v1292_v15, %v1326_v38  ;;  %v1355_v43 = vrot.slane %v1348_v39, %v1741_v28 }
 0x3cf   : > { %v1318_v33 = vmax.f32 %v1317_v32, 0.0 }
 0x3d1   : > { %v1329_v34 = vadd.f32 1e-05, %v1318_v33 }
 0x3d3   : > { %1551 = vrsqrt.f32 %v1329_v34 }
 0x3dd   : > { %v1552_v36 = vpop.eup %1551 }
 0x3de   : > { %v1331_v37 = vmul.f32 %v1552_v36, %v1295_v35 }
 0x3e0   : > { %1334 = vperm.xlu0 %1547, %v1331_v37  }
 0x45f   : > { %v1335_v40 = vpop.permute.xlu0 %1334 }
 0x460   : > { %v1342_v42 = vrot.slane %v1335_v40, %v1741_v28 }
 0x462   : > { %v1344_v44 = vmul.f32 %v1342_v42, %v1328_v41 }
 0x464   : > { %v1357_v45 = vadd.f32 %v1355_v43, %v1344_v44 }
 0x466   : > { %vm1358_vm12 = vcmp.ge.f32.partialorder %v1357_v45, 0.0  ;;  %v1359_v46 = vmul.f32 0.01, %v1357_v45 }
 0x468   : > { %v1360_v47 = vsel %vm1358_vm12, %v1357_v45, %v1359_v46 }
 0x469   : > { %1361 = vst [vmem:[%s314_s18] sm:$0xff] %v1360_v47 }
 0x46a   : > { %1566 = shalt.err (!%p1563_p3)
}
 0x46b   : > { %s1567_s27 = scalar_lea.hbm %s1943_s22, 128  ;;  %s1571_s13 = scalar_lea.hbm %s1993_s8, 256 }
 0x46c   : > { %p1568_p4 = scmp.ne.s32.totalorder %s1943_s22, %s1567_s27  ;;  %p1572_p9 = scmp.lt.u32.totalorder %s1943_s22, %s1993_s8 }
 0x46d   : > { %p1573_p10 = scmp.lt.u32.totalorder %s1571_s13, %s1567_s27  ;;  %p1575_p12 = scmp.lt.u32.totalorder %s1567_s27, %s1943_s22 }
 0x46e   : > { %p1569_p7 = pnand %p1568_p4, %p1711_p5 }
 0x46f   : > { %p1574_p11 = por %p1573_p10, %p1572_p9 }
 0x470   : > { %p1570_p8 = pneg %p1569_p7 }
 0x471   : > { %p1576_p13 = por %p1575_p12, %p1574_p11 }
 0x473   : > { %p1577_p0 = pnand %p1576_p13, %p1570_p8 }
 0x475   : > { %1580 = shalt.err (!%p1577_p0)
}
 0x476   : > { %1500 = dma.vmem_to_hbm [thread:$0]  (%p1711_p5), %s1945_s19, 128, %s1943_s22, %s1363_s23  }
 0x477 PF: > { %p1506_p1 = scmp.ge.s32.totalorder %s1615_s10, 2  ;;  %s1389_s20 = sand.u32 1, %s1603_s29  }
 0x478   : > { %s1390_s21 = scalar_lea.sflag [#allocation5], %s1389_s20 }
 0x479   : > { %p1503_p2 = pnand %p1506_p1, %p1715_p6 }
 0x47b   : > { %1598 = dma.done.wait (!%p1503_p2), %s1390_s21, 128  }
 0x47c   : > { %1600 = vsyncadd (!%p1503_p2), %s1390_s21, 4294967168  ;;  %p19_p3 = scmp.ge.s32.totalorder %s1698_s12, 4   ;;  %s2004_s29 = smov %s1607_s30 }
 0x47d   : > { %s2005_s30 = smov %s1611_s9  ;;  %s2006_s9 = smov %s1709_s15 }
 0x47e   : > { %s2007_s10 = smov %s1698_s12  ;;  %21 = sbr.rel (!%p19_p3) target bundleno = 5 (0x5), region = 98 }
 0x485   :  { %1395 = vsyncpa [#allocation5], 1 }
 0x486   :  { %1397 = vsyncpa [#allocation5 + $0x1], 1 }

</bundles_post_ra>
